<compile_context>
chip_gen: v7x
topology: tpu7x:2x2x1
jax: 0.10.0
libtpu: 0.0.40
codegen_flags: <defaults>
</compile_context>

<pallas_src>
import math

import jax
import jax.numpy as jnp
from jax.experimental import pallas as pl
from jax.experimental.pallas import tpu as pltpu


STATE_SIZE = 4
FC1_UNITS = 32
FC2_UNITS = 32
PAD = 128           # lane-dense padded feature width
MAX_TILE = 512      # row-tile sweet spot for pipelining (multiple of 8)


def _round_up(x, m):
    return ((x + m - 1) // m) * m


def _encoder_kernel(x_ref, w1_ref, b1_ref, w2_ref, b2_ref, z_ref):
    # x_ref: (tm, STATE_SIZE); weights padded to 128 lanes; z_ref: (tm, 128)
    x = x_ref[...]
    h = jnp.dot(x, w1_ref[...], preferred_element_type=jnp.float32) + b1_ref[...]
    h = jnp.maximum(h, 0.0)                      # ReLU (padded cols stay 0)
    z = jnp.dot(h, w2_ref[...], preferred_element_type=jnp.float32) + b2_ref[...]
    z = jnp.maximum(z, 0.0)                      # ReLU
    z_ref[...] = z.astype(z_ref.dtype)


def encoder_pallas(x, padded_params):
    """Apply the two-layer ReLU MLP encoder to a (N, state_size) batch.

    `padded_params` are (w1p, b1p, w2p, b2p) zero-padded to 128 output lanes.
    Returns (N, FC2_UNITS) float32.
    """
    w1p, b1p, w2p, b2p = padded_params
    N = x.shape[0]

    # Row tiling: big tiles (up to MAX_TILE) for pipelining; tiny batches use a
    # single 8-aligned tile (minimize serial grid steps, esp. on v5e).
    if N >= MAX_TILE:
        tile = MAX_TILE
        n_pad = _round_up(N, tile)
    else:
        n_pad = _round_up(max(N, 8), 8)
        tile = n_pad

    x_pad = x if n_pad == N else jnp.pad(x, ((0, n_pad - N), (0, 0)))
    grid = (n_pad // tile,)

    out = pl.pallas_call(
        _encoder_kernel,
        out_shape=jax.ShapeDtypeStruct((n_pad, PAD), jnp.float32),
        grid=grid,
        in_specs=[
            pl.BlockSpec((tile, STATE_SIZE), lambda i: (i, 0)),   # x rows
            pl.BlockSpec((STATE_SIZE, PAD), lambda i: (0, 0)),    # W1 (resident)
            pl.BlockSpec((1, PAD), lambda i: (0, 0)),             # b1
            pl.BlockSpec((PAD, PAD), lambda i: (0, 0)),           # W2
            pl.BlockSpec((1, PAD), lambda i: (0, 0)),             # b2
        ],
        out_specs=pl.BlockSpec((tile, PAD), lambda i: (i, 0)),
        compiler_params=pltpu.CompilerParams(
            dimension_semantics=("parallel",)),
    )(x_pad, w1p, b1p, w2p, b2p)

    return out[:N, :FC2_UNITS]


def init_params(key):
    """Deterministic init mimicking nn.Linear default (uniform +/- 1/sqrt(fan_in)).

    Weights stored as (in_features, out_features) so the kernel does x @ W.
    """
    k1, k2, k3, k4 = jax.random.split(key, 4)
    bound1 = 1.0 / math.sqrt(STATE_SIZE)
    bound2 = 1.0 / math.sqrt(FC1_UNITS)
    w1 = jax.random.uniform(k1, (STATE_SIZE, FC1_UNITS), jnp.float32, -bound1, bound1)
    b1 = jax.random.uniform(k2, (1, FC1_UNITS), jnp.float32, -bound1, bound1)
    w2 = jax.random.uniform(k3, (FC1_UNITS, FC2_UNITS), jnp.float32, -bound2, bound2)
    b2 = jax.random.uniform(k4, (1, FC2_UNITS), jnp.float32, -bound2, bound2)
    return w1, b1, w2, b2


def pad_params(params):
    """Zero-pad parameters to 128 lanes once (lane-dense dots/stores).

    Padded columns of b1/b2 are zero, so ReLU keeps the padded hidden/output
    lanes at exactly 0 and slicing [:, :32] recovers the original result.
    """
    w1, b1, w2, b2 = params
    w1p = jnp.zeros((STATE_SIZE, PAD), jnp.float32).at[:, :FC1_UNITS].set(w1)
    b1p = jnp.zeros((1, PAD), jnp.float32).at[:, :FC1_UNITS].set(b1)
    w2p = jnp.zeros((PAD, PAD), jnp.float32).at[:FC1_UNITS, :FC2_UNITS].set(w2)
    b2p = jnp.zeros((1, PAD), jnp.float32).at[:, :FC2_UNITS].set(b2)
    return w1p, b1p, w2p, b2p


def abstract_dqn_forward(data, padded_params):
    """Pallas equivalent of AbstractDQN.forward: encodes every state in the list.

    All states are concatenated along the batch axis and encoded with a single
    pallas_call (one launch, weights loaded once), then split back per state.
    """
    states = data['state']
    sizes = [s.shape[0] for s in states]
    x_all = jnp.concatenate(states, axis=0)
    z_all = encoder_pallas(x_all, padded_params)
    zs, off = [], 0
    for n in sizes:
        zs.append(z_all[off:off + n])
        off += n
    data['z'] = zs
    # TODO(synk): self._forward(data) is abstract in AbstractDQN (raises
    # NotImplementedError); nothing to translate, so return the encodings.
    return data['z']


def _reference_encoder(x, w1, b1, w2, b2):
    h = jnp.maximum(x @ w1 + b1, 0.0)
    return jnp.maximum(h @ w2 + b2, 0.0)


if __name__ == "__main__":
    key = jax.random.PRNGKey(0)
    pkey, s1key, s2key = jax.random.split(key, 3)
    params = init_params(pkey)
    padded = pad_params(params)

    batch = 8
    data = {
        'state': [
            jax.random.normal(s1key, (batch, STATE_SIZE), jnp.float32),
            jax.random.normal(s2key, (batch, STATE_SIZE), jnp.float32),
        ]
    }

    zs = abstract_dqn_forward(data, padded)
    zs = [jax.block_until_ready(z) for z in zs]

    # correctness check against pure-JAX reference (unpadded params)
    for s, z in zip(data['state'], zs):
        ref = _reference_encoder(s, *params)
        assert z.shape == (batch, FC2_UNITS)
        assert jnp.allclose(z, ref, atol=1e-5, rtol=1e-5), "mismatch vs reference"

    print("KERNEL_OK")
</pallas_src>

<mosaic_0001>
module attributes {stable_mosaic.version = 11 : i64} {
  func.func @_encoder_kernel(%arg0: i32, %arg1: memref<16x4xf32, #tpu.memory_space<vmem>>, %arg2: memref<4x128xf32, #tpu.memory_space<vmem>>, %arg3: memref<1x128xf32, #tpu.memory_space<vmem>>, %arg4: memref<128x128xf32, #tpu.memory_space<vmem>>, %arg5: memref<1x128xf32, #tpu.memory_space<vmem>>, %arg6: memref<16x128xf32, #tpu.memory_space<vmem>>) attributes {dimension_semantics = [#tpu.dimension_semantics<parallel>], iteration_bounds = array<i64: 1>, scalar_prefetch = 0 : i64, scratch_operands = 0 : i64, tpu.core_type = #tpu.core_type<tc>, window_params = [{transform_indices = @transform_0, window_bounds = array<i64: 16, 4>}, {pipeline_mode = #tpu.pipeline_mode<synchronous>, transform_indices = @transform_1, window_bounds = array<i64: 4, 128>}, {pipeline_mode = #tpu.pipeline_mode<synchronous>, transform_indices = @transform_2, window_bounds = array<i64: 1, 128>}, {pipeline_mode = #tpu.pipeline_mode<synchronous>, transform_indices = @transform_3, window_bounds = array<i64: 128, 128>}, {pipeline_mode = #tpu.pipeline_mode<synchronous>, transform_indices = @transform_4, window_bounds = array<i64: 1, 128>}, {transform_indices = @transform_5, window_bounds = array<i64: 16, 128>}]} {
    %c0 = arith.constant 0 : index
    %c0_0 = arith.constant 0 : index
    %0 = vector.load %arg1[%c0, %c0_0] : memref<16x4xf32, #tpu.memory_space<vmem>>, vector<16x4xf32>
    %c0_1 = arith.constant 0 : index
    %c0_2 = arith.constant 0 : index
    %1 = vector.load %arg2[%c0_1, %c0_2] : memref<4x128xf32, #tpu.memory_space<vmem>>, vector<4x128xf32>
    %cst = arith.constant dense<0.000000e+00> : vector<16x128xf32>
    %2 = tpu.matmul %0, %1, %cst {dimension_numbers = #tpu.dot_dimension_numbers<[1], [0], [0], [1], [0, 0, 1, 1], [], []>} : vector<16x4xf32>, vector<4x128xf32>, vector<16x128xf32> -> vector<16x128xf32>
    %c0_3 = arith.constant 0 : index
    %c0_4 = arith.constant 0 : index
    %3 = vector.load %arg3[%c0_3, %c0_4] : memref<1x128xf32, #tpu.memory_space<vmem>>, vector<1x128xf32>
    %4 = vector.broadcast %3 : vector<1x128xf32> to vector<16x128xf32>
    %5 = arith.addf %2, %4 : vector<16x128xf32>
    %cst_5 = arith.constant 0.000000e+00 : f32
    %6 = vector.broadcast %cst_5 : f32 to vector<16x128xf32>
    %7 = arith.maximumf %5, %6 : vector<16x128xf32>
    %c0_6 = arith.constant 0 : index
    %c0_7 = arith.constant 0 : index
    %8 = vector.load %arg4[%c0_6, %c0_7] : memref<128x128xf32, #tpu.memory_space<vmem>>, vector<128x128xf32>
    %cst_8 = arith.constant dense<0.000000e+00> : vector<16x128xf32>
    %9 = tpu.matmul %7, %8, %cst_8 {dimension_numbers = #tpu.dot_dimension_numbers<[1], [0], [0], [1], [0, 0, 1, 1], [], []>} : vector<16x128xf32>, vector<128x128xf32>, vector<16x128xf32> -> vector<16x128xf32>
    %c0_9 = arith.constant 0 : index
    %c0_10 = arith.constant 0 : index
    %10 = vector.load %arg5[%c0_9, %c0_10] : memref<1x128xf32, #tpu.memory_space<vmem>>, vector<1x128xf32>
    %11 = vector.broadcast %10 : vector<1x128xf32> to vector<16x128xf32>
    %12 = arith.addf %9, %11 : vector<16x128xf32>
    %cst_11 = arith.constant 0.000000e+00 : f32
    %13 = vector.broadcast %cst_11 : f32 to vector<16x128xf32>
    %14 = arith.maximumf %12, %13 : vector<16x128xf32>
    %c0_12 = arith.constant 0 : index
    %c0_13 = arith.constant 0 : index
    %15 = vector.load %arg6[%c0_12, %c0_13] : memref<16x128xf32, #tpu.memory_space<vmem>>, vector<16x128xf32>
    tpu.vector_store %arg6[%c0_12, %c0_13], %14 {strides = array<i32>} : memref<16x128xf32, #tpu.memory_space<vmem>>, vector<16x128xf32>,
    return
  }
  func.func @transform_0(%arg0: i32) -> (i32, i32) {
    %c0_i32 = arith.constant 0 : i32
    %c0_i32_0 = arith.constant 0 : i32
    return %arg0, %c0_i32 : i32, i32
  }
  func.func @transform_1(%arg0: i32) -> (i32, i32) {
    %c0_i32 = arith.constant 0 : i32
    %c0_i32_0 = arith.constant 0 : i32
    %c0_i32_1 = arith.constant 0 : i32
    return %c0_i32, %c0_i32_0 : i32, i32
  }
  func.func @transform_2(%arg0: i32) -> (i32, i32) {
    %c0_i32 = arith.constant 0 : i32
    %c0_i32_0 = arith.constant 0 : i32
    %c0_i32_1 = arith.constant 0 : i32
    return %c0_i32, %c0_i32_0 : i32, i32
  }
  func.func @transform_3(%arg0: i32) -> (i32, i32) {
    %c0_i32 = arith.constant 0 : i32
    %c0_i32_0 = arith.constant 0 : i32
    %c0_i32_1 = arith.constant 0 : i32
    return %c0_i32, %c0_i32_0 : i32, i32
  }
  func.func @transform_4(%arg0: i32) -> (i32, i32) {
    %c0_i32 = arith.constant 0 : i32
    %c0_i32_0 = arith.constant 0 : i32
    %c0_i32_1 = arith.constant 0 : i32
    return %c0_i32, %c0_i32_0 : i32, i32
  }
  func.func @transform_5(%arg0: i32) -> (i32, i32) {
    %c0_i32 = arith.constant 0 : i32
    %c0_i32_0 = arith.constant 0 : i32
    return %arg0, %c0_i32 : i32, i32
  }
}

</mosaic_0001>

<bundles_post_ra>
// kernel: tpu_custom_call.1
= control target key start
LH: loop header
LB: loop body
LE: loop exit
PB: predicated region body
PF: predicated region fallthrough
CT: control target
= control target key end

     0   :  { %10 = vsyncpa [#allocation3], 0  ;;  %s481_s0 = inlined_call_operand.vmem [shape: f32[16,4], index: 0, kind: input, shape index: {}]   ;;  %s482_s1 = inlined_call_operand.vmem [shape: f32[4,128], index: 1, kind: input, shape index: {}]   ;;  %s483_s2 = inlined_call_operand.vmem [shape: f32[1,128], index: 2, kind: input, shape index: {}]   ;;  %s484_s3 = inlined_call_operand.hbm [shape: f32[128,128], index: 3, kind: input, shape index: {}]   ;;  %s485_s4 = inlined_call_operand.vmem [shape: f32[1,128], index: 4, kind: input, shape index: {}]   ;;  %s486_s5 = inlined_call_operand.hbm [shape: f32[16,128], index: 5, kind: output, shape index: {}]  }
   0x1   :  { %11 = vsyncpa [#allocation4], 0  ;;  %s402_s18 = smov [#allocation2]   ;;  %s354_s22 = scalar_lea.hbm %s484_s3, 2048 }
   0x2   :  { %s23_s19 = sshll.u32 %s402_s18, 4  ;;  %p355_p0 = scmp.ne.s32.totalorder %s484_s3, %s354_s22  ;;  %s24_s19 = int_to_ptr.vmem [resolvable:$true] %s23_s19 }
   0x3   :  { %p358_p1 = scmp.lt.u32.totalorder %s354_s22, %s484_s3 }
   0x5   :  { %p360_p2 = pnand %p358_p1, %p355_p0 }
   0x7   :  { %363 = shalt.err (!%p360_p2)
}
   0x8   :  { %s364_s27 = scalar_lea.vmem %s24_s19, 2048  ;;  %p369_p4 = scmp.lt.s32.totalorder %s24_s19, %s24_s19 }
   0x9   :  { %p365_p3 = scmp.ne.s32.totalorder %s24_s19, %s364_s27  ;;  %p370_p5 = scmp.lt.s32.totalorder %s364_s27, %s364_s27 }
   0xb   :  { %p371_p6 = por %p370_p5, %p369_p4 }
   0xd   :  { %p372_p7 = pnand %p371_p6, %p365_p3 }
   0xf   :  { %375 = shalt.err (!%p372_p7)
}
  0x10   :  { %s403_s28 = smov 128   ;;  %s404_s29 = smov 8  }
  0x11   :  { %29 = dma.hbm_to_vmem [thread:$0]  %s484_s3, 2048, %s24_s19, [#allocation3], %s403_s28, %s403_s28, %s404_s29  }
  0x12   :  { %398 = dma.done.wait [#allocation3], 2048  }
  0x13   :  { %399 = vsyncadd [#allocation3], 4294965248  ;;  %vm52_vm0 = vcmask 1043456   ;;  %vm45_vm1 = vcmask 31744   ;;  %v37_v0 = vld [vmem:[%s482_s1] sm:$0xf] }
  0x14   :  { %v35_v1 = vld [vmem:[%s481_s0] sm:$0xff]  ;;  %v36_v2 = vld [vmem:[%s481_s0 + $0x8] sm:$0xff]  ;;  %278 = vmatprep.subr.msk.mxu0 %vm52_vm0, %v37_v0  ;;  %v135_v5 = vld [vmem:[#allocation2 + $0x10] sm:$0xff]  ;;  %s405_s14 = smov [#allocation5]  }
  0x15   :  { %280 = vmatprep.mubr.msk.f32.mxu0 %vm45_vm1, %v35_v1  ;;  %v133_v3 = vld [vmem:[#allocation2] sm:$0xff]  ;;  %v134_v4 = vld [vmem:[#allocation2 + $0x8] sm:$0xff]  ;;  %279 = vmatpush3.msk.msra.mxu0 %vm52_vm0, %v37_v0  ;;  %v136_v7 = vld [vmem:[#allocation2 + $0x18] sm:$0xff]  ;;  %s240_s15 = sshll.u32 %s405_s14, 4  ;;  %s241_s15 = int_to_ptr.vmem [resolvable:$true] %s240_s15 }
  0x16   :  { %v318_v6 = vpack.c.bf16 %v134_v4, %v133_v3  ;;  %281 = vmatmul.mubr.msk.f32.vlgmr.msra.gmra.mrb[0].mxu0 %vm45_vm1, %v36_v2  ;;  %v322_v8 = vpack.c.bf16 %v136_v7, %v135_v5  ;;  %v137_v9 = vld [vmem:[#allocation2 + $0x20] sm:$0xff]  ;;  %v138_v10 = vld [vmem:[#allocation2 + $0x28] sm:$0xff]  ;;  %v139_v12 = vld [vmem:[#allocation2 + $0x30] sm:$0xff]  ;;  %p381_p9 = scmp.lt.s32.totalorder %s241_s15, %s241_s15 }
  0x17   :  { %v326_v11 = vpack.c.bf16 %v138_v10, %v137_v9  ;;  %v140_v13 = vld [vmem:[#allocation2 + $0x38] sm:$0xff]  ;;  %v141_v15 = vld [vmem:[#allocation2 + $0x40] sm:$0xff]  ;;  %v142_v16 = vld [vmem:[#allocation2 + $0x48] sm:$0xff] }
  0x18   :  { %319 = vmatprep.subr.bf16.mxu1 %v318_v6  ;;  %v330_v14 = vpack.c.bf16 %v140_v13, %v139_v12  ;;  %v334_v17 = vpack.c.bf16 %v142_v16, %v141_v15  ;;  %v143_v18 = vld [vmem:[#allocation2 + $0x50] sm:$0xff]  ;;  %v144_v19 = vld [vmem:[#allocation2 + $0x58] sm:$0xff]  ;;  %v145_v21 = vld [vmem:[#allocation2 + $0x60] sm:$0xff] }
  0x19   :  { %321 = vmatpush3.bf16.msra.mxu1 %v318_v6  ;;  %v338_v20 = vpack.c.bf16 %v144_v19, %v143_v18  ;;  %v146_v22 = vld [vmem:[#allocation2 + $0x68] sm:$0xff]  ;;  %v147_v24 = vld [vmem:[#allocation2 + $0x70] sm:$0xff]  ;;  %v148_v25 = vld [vmem:[#allocation2 + $0x78] sm:$0xff] }
  0x1a   :  { %323 = vmatprep.subr.bf16.mxu1 %v322_v8  ;;  %v342_v23 = vpack.c.bf16 %v146_v22, %v145_v21  ;;  %v346_v26 = vpack.c.bf16 %v148_v25, %v147_v24  ;;  %v252_v27 = vld [vmem:[%s483_s2] ss:$0 sm:$0xff]  ;;  %s376_s2 = scalar_lea.vmem %s241_s15, 256 }
  0x1b   :  { %v256_v34 = vld [vmem:[%s485_s4] ss:$0 sm:$0xff]  ;;  %p377_p8 = scmp.ne.s32.totalorder %s241_s15, %s376_s2  ;;  %p382_p10 = scmp.lt.s32.totalorder %s376_s2, %s376_s2 }
  0x1d   :  { %325 = vmatpush3.bf16.msra.mxu1 %v322_v8  ;;  %p383_p11 = por %p382_p10, %p381_p9 }
  0x1e   :  { %327 = vmatprep.subr.bf16.mxu1 %v326_v11 }
  0x1f   :  { %p384_p12 = pnand %p383_p11, %p377_p8 }
  0x21   :  { %329 = vmatpush3.bf16.msra.mxu1 %v326_v11 }
  0x22   :  { %331 = vmatprep.subr.bf16.mxu1 %v330_v14 }
  0x25   :  { %333 = vmatpush3.bf16.msra.mxu1 %v330_v14 }
  0x26   :  { %335 = vmatprep.subr.bf16.mxu1 %v334_v17 }
  0x29   :  { %337 = vmatpush3.bf16.msra.mxu1 %v334_v17 }
  0x2a   :  { %339 = vmatprep.subr.bf16.mxu1 %v338_v20 }
  0x2d   :  { %341 = vmatpush3.bf16.msra.mxu1 %v338_v20 }
  0x2e   :  { %343 = vmatprep.subr.bf16.mxu1 %v342_v23 }
  0x31   :  { %345 = vmatpush3.bf16.msra.mxu1 %v342_v23 }
  0x32   :  { %347 = vmatprep.subr.bf16.mxu1 %v346_v26 }
  0x35   :  { %349 = vmatpush3.bf16.msra.mxu1 %v346_v26 }
  0xe9   :  { %v282_v28 = vpop.f32.mrb[0].mxu0 }
  0xea   :  { %v128_v29 = vadd.f32 %v282_v28, %v252_v27  ;;  %v122_v30 = vpop.f32.mrb[1].mxu0 }
  0xeb   :  { %v123_v31 = vadd.f32 %v252_v27, %v122_v30 }
  0xec   :  { %v132_v33 = vmax.f32 %v128_v29, 0.0 }
  0xed   :  { %v131_v32 = vmax.f32 %v123_v31, 0.0 }
  0xef   :  { %315 = vmatprep.mubr.f32.mxu1 %v131_v32 }
  0xf0   :  { %316 = vmatmul.mubr.f32.vlgmr.msra.gmra.mrb[0].mxu1 %v132_v33 }
 0x1c3   :  { %v317_v35 = vpop.f32.mrb[0].mxu1 }
 0x1c4   :  { %v228_v36 = vadd.f32 %v317_v35, %v256_v34  ;;  %v222_v37 = vpop.f32.mrb[1].mxu1 }
 0x1c5   :  { %v223_v38 = vadd.f32 %v256_v34, %v222_v37 }
 0x1c6   :  { %v232_v39 = vmax.f32 %v228_v36, 0.0 }
 0x1c7   :  { %v231_v40 = vmax.f32 %v223_v38, 0.0 }
 0x1c8   :  { %234 = vst [vmem:[#allocation5 + $0x8] sm:$0xff] %v232_v39 }
 0x1c9   :  { %233 = vst [vmem:[#allocation5] sm:$0xff] %v231_v40 }
 0x1ca   :  { %387 = shalt.err (!%p384_p12)
}
 0x1cb   :  { %s388_s17 = scalar_lea.hbm %s486_s5, 256 }
 0x1cc   :  { %p389_p13 = scmp.ne.s32.totalorder %s486_s5, %s388_s17  ;;  %p392_p0 = scmp.lt.u32.totalorder %s388_s17, %s486_s5 }
 0x1ce   :  { %p394_p1 = pnand %p392_p0, %p389_p13 }
 0x1d0   :  { %397 = shalt.err (!%p394_p1)
}
 0x1d1   :  { %246 = dma.vmem_to_hbm [thread:$0]  %s241_s15, 256, %s486_s5, [#allocation4], %s403_s28, %s403_s28, %s404_s29  }
 0x1d2   :  { %400 = dma.done.wait [#allocation4], 256  }
 0x1d3   :  { %401 = vsyncadd [#allocation4], 4294967040 }
 0x1d4   :  { %250 = vsyncpa [#allocation3], 1 }
 0x1d5   :  { %251 = vsyncpa [#allocation4], 1 }

</bundles_post_ra>
